<compile_context>
chip_gen: v5e
topology: v5e:2x2
jax: 0.10.0
libtpu: 0.0.40
codegen_flags: <defaults>
</compile_context>

<pallas_src>
import functools
import math

import jax
import jax.numpy as jnp
from jax.experimental import pallas as pl
from jax.experimental.pallas import tpu as pltpu


DEFAULT_TM = 256
DEFAULT_TN = 256
DEFAULT_TK = 512
R_PAD = 128  # pad LoRA rank up to one full lane group


def _round_up(x, m):
    return (x + m - 1) // m * m


def _lora_linear_kernel(x_ref, wt_ref, b_ref, at_ref, bt_ref, o_ref,
                        acc_ref, ax_ref):
    # x_ref:  [tm, tk]   activation tile
    # wt_ref: [tk, tn]   frozen W^T tile
    # b_ref:  [1,  tn]   bias tile
    # at_ref: [tk, rp]   A^T tile (rank padded to rp lanes)
    # bt_ref: [rp, tn]   scaling * B^T tile
    # o_ref:  [tm, tn]   output tile (resident across the K axis)
    # acc_ref:[tm, tn]   f32 base-GEMM accumulator (scratch)
    # ax_ref: [tm, rp]   f32 x@A^T accumulator (scratch)
    k = pl.program_id(2)

    @pl.when(k == 0)
    def _init():
        acc_ref[...] = jnp.zeros_like(acc_ref)
        ax_ref[...] = jnp.zeros_like(ax_ref)

    x = x_ref[...]
    acc_ref[...] += jnp.dot(x, wt_ref[...], preferred_element_type=jnp.float32)
    ax_ref[...] += jnp.dot(x, at_ref[...], preferred_element_type=jnp.float32)

    @pl.when(k == pl.num_programs(2) - 1)
    def _finalize():
        # Rank-r matmul + bias + (pre-folded) scaling: once per output tile.
        lora = jnp.dot(ax_ref[...].astype(bt_ref.dtype), bt_ref[...],
                       preferred_element_type=jnp.float32)
        o_ref[...] = (acc_ref[...] + b_ref[...].astype(jnp.float32)
                      + lora).astype(o_ref.dtype)


def prepare_lora_params(w, b, a, bmat, scaling, *,
                        tn=DEFAULT_TN, tk=DEFAULT_TK, r_pad=R_PAD):
    """One-time (init-time) layout prep: transpose, fold scaling, pad to tiles.

    w:    [out, in]  frozen Linear weight
    b:    [out]      frozen Linear bias
    a:    [r, in]    lora_A weight
    bmat: [out, r]   lora_B weight
    Returns (wt, b2d, at, bt, meta) with everything padded to tile multiples.
    """
    out_f, in_f = w.shape
    r = a.shape[0]

    tn = min(tn, _round_up(out_f, 128))
    tk = min(tk, _round_up(in_f, 128))
    kp = _round_up(in_f, tk)
    np_ = _round_up(out_f, tn)
    rp = _round_up(max(r, 1), r_pad)

    wt = jnp.zeros((kp, np_), w.dtype).at[:in_f, :out_f].set(w.T)
    b2d = jnp.zeros((1, np_), b.dtype).at[0, :out_f].set(b)
    at = jnp.zeros((kp, rp), a.dtype).at[:in_f, :r].set(a.T)
    # Fold scaling into B^T once (removes a per-tile VPU multiply in the kernel).
    bt = jnp.zeros((rp, np_), bmat.dtype).at[:r, :out_f].set(
        (scaling * bmat.astype(jnp.float32)).astype(bmat.dtype).T)

    meta = dict(in_f=in_f, out_f=out_f, kp=kp, np_=np_, rp=rp, tn=tn, tk=tk)
    return wt, b2d, at, bt, meta


def lora_linear(x, wt, b2d, at, bt, meta, *, tm=DEFAULT_TM):
    """x: [batch, seq, in]; remaining args from prepare_lora_params()."""
    batch, seq, in_f = x.shape
    assert in_f == meta["in_f"]
    out_f, kp, np_, rp = meta["out_f"], meta["kp"], meta["np_"], meta["rp"]
    tn, tk = meta["tn"], meta["tk"]

    m = batch * seq
    tm = min(tm, _round_up(m, 8))
    mp = _round_up(m, tm)

    x2d = x.reshape(m, in_f)
    if (mp, kp) != (m, in_f):
        x2d = jnp.zeros((mp, kp), x2d.dtype).at[:m, :in_f].set(x2d)

    grid = (mp // tm, np_ // tn, kp // tk)

    out2d = pl.pallas_call(
        _lora_linear_kernel,
        out_shape=jax.ShapeDtypeStruct((mp, np_), x.dtype),
        grid_spec=pltpu.PrefetchScalarGridSpec(
            num_scalar_prefetch=0,
            grid=grid,
            in_specs=[
                pl.BlockSpec((tm, tk), lambda i, j, k: (i, k)),   # x tile
                pl.BlockSpec((tk, tn), lambda i, j, k: (k, j)),   # W^T tile
                pl.BlockSpec((1, tn), lambda i, j, k: (0, j)),    # bias tile
                pl.BlockSpec((tk, rp), lambda i, j, k: (k, 0)),   # A^T tile
                pl.BlockSpec((rp, tn), lambda i, j, k: (0, j)),   # scaled B^T tile
            ],
            out_specs=pl.BlockSpec((tm, tn), lambda i, j, k: (i, j)),
            scratch_shapes=[
                pltpu.VMEM((tm, tn), jnp.float32),   # base accumulator
                pltpu.VMEM((tm, rp), jnp.float32),   # x @ A^T accumulator
            ],
        ),
        compiler_params=pltpu.CompilerParams(
            dimension_semantics=("parallel", "parallel", "arbitrary")),
    )(x2d, wt, b2d, at, bt)

    return out2d[:m, :out_f].reshape(batch, seq, out_f)


def _kaiming_uniform(key, shape, a=math.sqrt(5)):
    # Mirrors torch.nn.init.kaiming_uniform_ (fan_in mode, leaky_relu gain).
    fan_in = shape[1]
    gain = math.sqrt(2.0 / (1.0 + a * a))
    bound = gain * math.sqrt(3.0 / fan_in)
    return jax.random.uniform(key, shape, jnp.float32, -bound, bound)


if __name__ == "__main__":
    key = jax.random.PRNGKey(0)
    k_x, k_w, k_b, k_a, k_bb = jax.random.split(key, 5)

    batch, seq, hidden = 2, 8, 32
    r, alpha = 8, 16
    scaling = alpha / r

    # Frozen "orig" Linear(hidden -> hidden): weight [out, in], bias [out].
    w = jax.random.normal(k_w, (hidden, hidden), jnp.float32) * 0.05
    b = jax.random.normal(k_b, (hidden,), jnp.float32) * 0.05

    # LoRA params per module __init__: A kaiming-uniform(a=sqrt(5)), B zeros.
    lora_a = _kaiming_uniform(k_a, (r, hidden))
    lora_b = jnp.zeros((hidden, r), jnp.float32)

    x = jax.random.normal(k_x, (batch, seq, hidden), jnp.float32)

    def reference(x, w, b, a, bmat):
        return (x @ w.T + b) + scaling * ((x @ a.T) @ bmat.T)

    # --- module-faithful init (lora_B == 0) ---
    params = prepare_lora_params(w, b, lora_a, lora_b, scaling)
    out = lora_linear(x, *params)
    out = jax.block_until_ready(out)
    ref = reference(x, w, b, lora_a, lora_b)
    assert out.shape == (batch, seq, hidden)
    assert jnp.allclose(out, ref, atol=1e-5, rtol=1e-5)

    # --- also exercise a non-zero LoRA B path (e.g. after training) ---
    lora_b_trained = jax.random.normal(k_bb, (hidden, r), jnp.float32) * 0.1
    params2 = prepare_lora_params(w, b, lora_a, lora_b_trained, scaling)
    out2 = jax.block_until_ready(lora_linear(x, *params2))
    ref2 = reference(x, w, b, lora_a, lora_b_trained)
    assert jnp.allclose(out2, ref2, atol=1e-5, rtol=1e-5)

    print("KERNEL_OK")
</pallas_src>

<mosaic_0001>
module attributes {stable_mosaic.version = 11 : i64} {
  func.func @_lora_linear_kernel(%arg0: i32, %arg1: i32, %arg2: i32, %arg3: memref<16x128xf32, #tpu.memory_space<vmem>>, %arg4: memref<128x128xf32, #tpu.memory_space<vmem>>, %arg5: memref<1x128xf32, #tpu.memory_space<vmem>>, %arg6: memref<128x128xf32, #tpu.memory_space<vmem>>, %arg7: memref<128x128xf32, #tpu.memory_space<vmem>>, %arg8: memref<16x128xf32, #tpu.memory_space<vmem>>, %arg9: memref<16x128xf32, #tpu.memory_space<vmem>>, %arg10: memref<16x128xf32, #tpu.memory_space<vmem>>) attributes {dimension_semantics = [#tpu.dimension_semantics<parallel>, #tpu.dimension_semantics<parallel>, #tpu.dimension_semantics<arbitrary>], iteration_bounds = array<i64: 1, 1, 1>, scalar_prefetch = 0 : i64, scratch_operands = 2 : i64, tpu.core_type = #tpu.core_type<tc>, window_params = [{transform_indices = @transform_0, window_bounds = array<i64: 16, 128>}, {transform_indices = @transform_1, window_bounds = array<i64: 128, 128>}, {transform_indices = @transform_2, window_bounds = array<i64: 1, 128>}, {transform_indices = @transform_3, window_bounds = array<i64: 128, 128>}, {transform_indices = @transform_4, window_bounds = array<i64: 128, 128>}, {transform_indices = @transform_5, window_bounds = array<i64: 16, 128>}]} {
    %c0_i32 = arith.constant 0 : i32
    %0 = arith.cmpi eq, %arg2, %c0_i32 : i32
    %1 = arith.extui %0 : i1 to i32
    %c0_i32_0 = arith.constant 0 : i32
    %2 = arith.cmpi ne, %1, %c0_i32_0 : i32
    scf.if %2 {
      %cst_17 = arith.constant 0.000000e+00 : f32
      %17 = vector.broadcast %cst_17 : f32 to vector<16x128xf32>
      %c0_18 = arith.constant 0 : index
      %c0_19 = arith.constant 0 : index
      %18 = vector.load %arg9[%c0_18, %c0_19] : memref<16x128xf32, #tpu.memory_space<vmem>>, vector<16x128xf32>
      tpu.vector_store %arg9[%c0_18, %c0_19], %17 {strides = array<i32>} : memref<16x128xf32, #tpu.memory_space<vmem>>, vector<16x128xf32>,
      %cst_20 = arith.constant 0.000000e+00 : f32
      %19 = vector.broadcast %cst_20 : f32 to vector<16x128xf32>
      %c0_21 = arith.constant 0 : index
      %c0_22 = arith.constant 0 : index
      %20 = vector.load %arg10[%c0_21, %c0_22] : memref<16x128xf32, #tpu.memory_space<vmem>>, vector<16x128xf32>
      tpu.vector_store %arg10[%c0_21, %c0_22], %19 {strides = array<i32>} : memref<16x128xf32, #tpu.memory_space<vmem>>, vector<16x128xf32>,
    } else {
    }
    %c0 = arith.constant 0 : index
    %c0_1 = arith.constant 0 : index
    %3 = vector.load %arg3[%c0, %c0_1] : memref<16x128xf32, #tpu.memory_space<vmem>>, vector<16x128xf32>
    %c0_2 = arith.constant 0 : index
    %c0_3 = arith.constant 0 : index
    %4 = vector.load %arg9[%c0_2, %c0_3] : memref<16x128xf32, #tpu.memory_space<vmem>>, vector<16x128xf32>
    %c0_4 = arith.constant 0 : index
    %c0_5 = arith.constant 0 : index
    %5 = vector.load %arg4[%c0_4, %c0_5] : memref<128x128xf32, #tpu.memory_space<vmem>>, vector<128x128xf32>
    %cst = arith.constant dense<0.000000e+00> : vector<16x128xf32>
    %6 = tpu.matmul %3, %5, %cst {dimension_numbers = #tpu.dot_dimension_numbers<[1], [0], [0], [1], [0, 0, 1, 1], [], []>} : vector<16x128xf32>, vector<128x128xf32>, vector<16x128xf32> -> vector<16x128xf32>
    %7 = arith.addf %4, %6 : vector<16x128xf32>
    %c0_6 = arith.constant 0 : index
    %c0_7 = arith.constant 0 : index
    %8 = vector.load %arg9[%c0_6, %c0_7] : memref<16x128xf32, #tpu.memory_space<vmem>>, vector<16x128xf32>
    tpu.vector_store %arg9[%c0_6, %c0_7], %7 {strides = array<i32>} : memref<16x128xf32, #tpu.memory_space<vmem>>, vector<16x128xf32>,
    %c0_8 = arith.constant 0 : index
    %c0_9 = arith.constant 0 : index
    %9 = vector.load %arg10[%c0_8, %c0_9] : memref<16x128xf32, #tpu.memory_space<vmem>>, vector<16x128xf32>
    %c0_10 = arith.constant 0 : index
    %c0_11 = arith.constant 0 : index
    %10 = vector.load %arg6[%c0_10, %c0_11] : memref<128x128xf32, #tpu.memory_space<vmem>>, vector<128x128xf32>
    %cst_12 = arith.constant dense<0.000000e+00> : vector<16x128xf32>
    %11 = tpu.matmul %3, %10, %cst_12 {dimension_numbers = #tpu.dot_dimension_numbers<[1], [0], [0], [1], [0, 0, 1, 1], [], []>} : vector<16x128xf32>, vector<128x128xf32>, vector<16x128xf32> -> vector<16x128xf32>
    %12 = arith.addf %9, %11 : vector<16x128xf32>
    %c0_13 = arith.constant 0 : index
    %c0_14 = arith.constant 0 : index
    %13 = vector.load %arg10[%c0_13, %c0_14] : memref<16x128xf32, #tpu.memory_space<vmem>>, vector<16x128xf32>
    tpu.vector_store %arg10[%c0_13, %c0_14], %12 {strides = array<i32>} : memref<16x128xf32, #tpu.memory_space<vmem>>, vector<16x128xf32>,
    %c0_i32_15 = arith.constant 0 : i32
    %14 = arith.cmpi eq, %arg2, %c0_i32_15 : i32
    %15 = arith.extui %14 : i1 to i32
    %c0_i32_16 = arith.constant 0 : i32
    %16 = arith.cmpi ne, %15, %c0_i32_16 : i32
    scf.if %16 {
      %c0_17 = arith.constant 0 : index
      %c0_18 = arith.constant 0 : index
      %17 = vector.load %arg10[%c0_17, %c0_18] : memref<16x128xf32, #tpu.memory_space<vmem>>, vector<16x128xf32>
      %c0_19 = arith.constant 0 : index
      %c0_20 = arith.constant 0 : index
      %18 = vector.load %arg7[%c0_19, %c0_20] : memref<128x128xf32, #tpu.memory_space<vmem>>, vector<128x128xf32>
      %cst_21 = arith.constant dense<0.000000e+00> : vector<16x128xf32>
      %19 = tpu.matmul %17, %18, %cst_21 {dimension_numbers = #tpu.dot_dimension_numbers<[1], [0], [0], [1], [0, 0, 1, 1], [], []>} : vector<16x128xf32>, vector<128x128xf32>, vector<16x128xf32> -> vector<16x128xf32>
      %c0_22 = arith.constant 0 : index
      %c0_23 = arith.constant 0 : index
      %20 = vector.load %arg9[%c0_22, %c0_23] : memref<16x128xf32, #tpu.memory_space<vmem>>, vector<16x128xf32>
      %c0_24 = arith.constant 0 : index
      %c0_25 = arith.constant 0 : index
      %21 = vector.load %arg5[%c0_24, %c0_25] : memref<1x128xf32, #tpu.memory_space<vmem>>, vector<1x128xf32>
      %22 = vector.broadcast %21 : vector<1x128xf32> to vector<16x128xf32>
      %23 = arith.addf %20, %22 : vector<16x128xf32>
      %24 = arith.addf %23, %19 : vector<16x128xf32>
      %c0_26 = arith.constant 0 : index
      %c0_27 = arith.constant 0 : index
      %25 = vector.load %arg8[%c0_26, %c0_27] : memref<16x128xf32, #tpu.memory_space<vmem>>, vector<16x128xf32>
      tpu.vector_store %arg8[%c0_26, %c0_27], %24 {strides = array<i32>} : memref<16x128xf32, #tpu.memory_space<vmem>>, vector<16x128xf32>,
    } else {
    }
    return
  }
  func.func @transform_0(%arg0: i32, %arg1: i32, %arg2: i32) -> (i32, i32) {
    %c0_i32 = arith.constant 0 : i32
    return %arg0, %arg2 : i32, i32
  }
  func.func @transform_1(%arg0: i32, %arg1: i32, %arg2: i32) -> (i32, i32) {
    %c0_i32 = arith.constant 0 : i32
    return %arg2, %arg1 : i32, i32
  }
  func.func @transform_2(%arg0: i32, %arg1: i32, %arg2: i32) -> (i32, i32) {
    %c0_i32 = arith.constant 0 : i32
    %c0_i32_0 = arith.constant 0 : i32
    return %c0_i32, %arg1 : i32, i32
  }
  func.func @transform_3(%arg0: i32, %arg1: i32, %arg2: i32) -> (i32, i32) {
    %c0_i32 = arith.constant 0 : i32
    %c0_i32_0 = arith.constant 0 : i32
    return %arg2, %c0_i32 : i32, i32
  }
  func.func @transform_4(%arg0: i32, %arg1: i32, %arg2: i32) -> (i32, i32) {
    %c0_i32 = arith.constant 0 : i32
    %c0_i32_0 = arith.constant 0 : i32
    return %c0_i32, %arg1 : i32, i32
  }
  func.func @transform_5(%arg0: i32, %arg1: i32, %arg2: i32) -> (i32, i32) {
    %c0_i32 = arith.constant 0 : i32
    return %arg0, %arg1 : i32, i32
  }
}

</mosaic_0001>

<bundles_post_ra>
// kernel: tpu_custom_call.1
= control target key start
LH: loop header
LB: loop body
LE: loop exit
PB: predicated region body
PF: predicated region fallthrough
CT: control target
= control target key end

     0   :  { %10 = vsyncpa [#allocation5], 0  ;;  %s483_s0 = inlined_call_operand.hbm [shape: f32[16,128], index: 0, kind: input, shape index: {}]   ;;  %s484_s1 = inlined_call_operand.hbm [shape: f32[128,128], index: 1, kind: input, shape index: {}]   ;;  %s485_s2 = inlined_call_operand.vmem [shape: f32[1,128], index: 2, kind: input, shape index: {}]   ;;  %s486_s3 = inlined_call_operand.hbm [shape: f32[128,128], index: 3, kind: input, shape index: {}]   ;;  %s487_s4 = inlined_call_operand.hbm [shape: f32[128,128], index: 4, kind: input, shape index: {}]   ;;  %s488_s5 = inlined_call_operand.hbm [shape: f32[16,128], index: 5, kind: output, shape index: {}]  }
   0x1   :  { %11 = vsyncpa [#allocation8], 0 }
   0x2   :  { %12 = vsyncpa [#allocation11], 0 }
   0x3   :  { %13 = vsyncpa [#allocation6], 0  ;;  %s31_s20 = sshll.u32 %s484_s1, 4  ;;  %s413_s21 = smov [#allocation7]   ;;  %s32_s20 = int_to_ptr.hbm [resolvable:$true] %s31_s20 }
   0x4   :  { %s33_s22 = sshll.u32 %s413_s21, 4  ;;  %s18_s25 = sshll.u32 %s483_s0, 4  ;;  %s34_s22 = int_to_ptr.vmem [resolvable:$true] %s33_s22  ;;  %s19_s25 = int_to_ptr.hbm [resolvable:$true] %s18_s25 }
   0x5   :  { %s414_s26 = smov 128   ;;  %s415_s27 = smov 8  }
   0x6   :  { %39 = dma.hbm_to_vmem [thread:$0]  %s32_s20, 2048, %s34_s22, [#allocation8], %s414_s26, %s414_s26, %s415_s27  }
   0x7   :  { %s416_s28 = smov [#allocation4]   ;;  %s46_s1 = sshll.u32 %s486_s3, 4  ;;  %s47_s1 = int_to_ptr.hbm [resolvable:$true] %s46_s1 }
   0x8   :  { %s20_s29 = sshll.u32 %s416_s28, 4  ;;  %s59_s8 = sshll.u32 %s487_s4, 4  ;;  %s21_s29 = int_to_ptr.vmem [resolvable:$true] %s20_s29  ;;  %s60_s8 = int_to_ptr.hbm [resolvable:$true] %s59_s8 }
   0x9   :  { %26 = dma.hbm_to_vmem [thread:$0]  %s19_s25, 256, %s21_s29, [#allocation5], %s414_s26, %s414_s26, %s415_s27  }
   0xa   :  { %s417_s9 = smov [#allocation9]   ;;  %s418_s11 = smov [#allocation10]  }
   0xb   :  { %s48_s10 = sshll.u32 %s417_s9, 4  ;;  %s61_s3 = sshll.u32 %s418_s11, 4  ;;  %s49_s10 = int_to_ptr.vmem [resolvable:$true] %s48_s10  ;;  %s62_s3 = int_to_ptr.vmem [resolvable:$true] %s61_s3 }
   0xc   :  { %54 = dma.hbm_to_vmem [thread:$0]  %s47_s1, 2048, %s49_s10, [#allocation8], %s414_s26, %s414_s26, %s415_s27  }
   0xd   :  { %67 = dma.hbm_to_vmem [thread:$0]  %s60_s8, 2048, %s62_s3, [#allocation11], %s414_s26, %s414_s26, %s415_s27  }
   0xe   :  { %405 = dma.done.wait [#allocation5], 256  }
   0xf   :  { %406 = vsyncadd [#allocation5], 4294967040 }
  0x10   :  { %407 = dma.done.wait [#allocation8], 4096  }
  0x11   :  { %408 = vsyncadd [#allocation8], 4294963200 }
  0x12   :  { %409 = dma.done.wait [#allocation11], 2048  }
  0x13   :  { %410 = vsyncadd [#allocation11], 4294965248  ;;  %v156_v0 = vld [vmem:[#allocation9 + $0x78] sm:$0xff]  ;;  %v155_v1 = vld [vmem:[#allocation9 + $0x70] sm:$0xff]  ;;  %s419_s13 = smov [#allocation12]   ;;  %s246_s17 = sshll.u32 %s488_s5, 4  ;;  %s247_s17 = int_to_ptr.hbm [resolvable:$true] %s246_s17 }
  0x14   :  { %157 = vmatpush.msra.mxu1 %v156_v0  ;;  %v154_v2 = vld [vmem:[#allocation9 + $0x68] sm:$0xff]  ;;  %v153_v3 = vld [vmem:[#allocation9 + $0x60] sm:$0xff]  ;;  %v152_v4 = vld [vmem:[#allocation9 + $0x58] sm:$0xff]  ;;  %s244_s14 = sshll.u32 %s419_s13, 4  ;;  %s245_s14 = int_to_ptr.vmem [resolvable:$true] %s244_s14 }
  0x15   :  { %v151_v5 = vld [vmem:[#allocation9 + $0x50] sm:$0xff]  ;;  %v204_v6 = vld [vmem:[#allocation10 + $0x78] sm:$0xff]  ;;  %v150_v10 = vld [vmem:[#allocation9 + $0x48] sm:$0xff] }
  0x16   :  { %158 = vmatpush.msra.mxu1 %v155_v1  ;;  %v203_v7 = vld [vmem:[#allocation10 + $0x70] sm:$0xff]  ;;  %v111_v8 = vld [vmem:[#allocation7 + $0x78] sm:$0xff]  ;;  %205 = vmatpush.msra.mxu2 %v204_v6  ;;  %v202_v11 = vld [vmem:[#allocation10 + $0x68] sm:$0xff] }
  0x17   :  { %v110_v9 = vld [vmem:[#allocation7 + $0x70] sm:$0xff]  ;;  %112 = vmatpush.msra.mxu0 %v111_v8  ;;  %261 = vmatpush.msra.mxu3 %v111_v8  ;;  %v109_v12 = vld [vmem:[#allocation7 + $0x68] sm:$0xff]  ;;  %v149_v13 = vld [vmem:[#allocation9 + $0x40] sm:$0xff] }
  0x18   :  { %159 = vmatpush.msra.mxu1 %v154_v2  ;;  %206 = vmatpush.msra.mxu2 %v203_v7  ;;  %v201_v14 = vld [vmem:[#allocation10 + $0x60] sm:$0xff]  ;;  %v148_v16 = vld [vmem:[#allocation9 + $0x38] sm:$0xff]  ;;  %v147_v19 = vld [vmem:[#allocation9 + $0x30] sm:$0xff] }
  0x19   :  { %113 = vmatpush.msra.mxu0 %v110_v9  ;;  %262 = vmatpush.msra.mxu3 %v110_v9  ;;  %v108_v15 = vld [vmem:[#allocation7 + $0x60] sm:$0xff]  ;;  %v200_v17 = vld [vmem:[#allocation10 + $0x58] sm:$0xff]  ;;  %v199_v20 = vld [vmem:[#allocation10 + $0x50] sm:$0xff] }
  0x1a   :  { %160 = vmatpush.msra.mxu1 %v153_v3  ;;  %207 = vmatpush.msra.mxu2 %v202_v11  ;;  %v107_v18 = vld [vmem:[#allocation7 + $0x58] sm:$0xff]  ;;  %v106_v21 = vld [vmem:[#allocation7 + $0x50] sm:$0xff]  ;;  %v146_v22 = vld [vmem:[#allocation9 + $0x28] sm:$0xff] }
  0x1b   :  { %114 = vmatpush.msra.mxu0 %v109_v12  ;;  %263 = vmatpush.msra.mxu3 %v109_v12  ;;  %v198_v23 = vld [vmem:[#allocation10 + $0x48] sm:$0xff]  ;;  %v145_v25 = vld [vmem:[#allocation9 + $0x20] sm:$0xff]  ;;  %v144_v28 = vld [vmem:[#allocation9 + $0x18] sm:$0xff] }
  0x1c   :  { %161 = vmatpush.msra.mxu1 %v152_v4  ;;  %208 = vmatpush.msra.mxu2 %v201_v14  ;;  %v105_v24 = vld [vmem:[#allocation7 + $0x48] sm:$0xff]  ;;  %v197_v26 = vld [vmem:[#allocation10 + $0x40] sm:$0xff]  ;;  %v196_v29 = vld [vmem:[#allocation10 + $0x38] sm:$0xff] }
  0x1d   :  { %115 = vmatpush.msra.mxu0 %v108_v15  ;;  %264 = vmatpush.msra.mxu3 %v108_v15  ;;  %v104_v27 = vld [vmem:[#allocation7 + $0x40] sm:$0xff]  ;;  %v103_v30 = vld [vmem:[#allocation7 + $0x38] sm:$0xff]  ;;  %v143_v31 = vld [vmem:[#allocation9 + $0x10] sm:$0xff] }
  0x1e   :  { %162 = vmatpush.msra.mxu1 %v151_v5  ;;  %209 = vmatpush.msra.mxu2 %v200_v17  ;;  %v195_v32 = vld [vmem:[#allocation10 + $0x30] sm:$0xff]  ;;  %v142_v34 = vld [vmem:[#allocation9 + $0x8] sm:$0xff]  ;;  %v141_v37 = vld [vmem:[#allocation9] sm:$0xff] }
  0x1f   :  { %116 = vmatpush.msra.mxu0 %v107_v18  ;;  %265 = vmatpush.msra.mxu3 %v107_v18  ;;  %v102_v33 = vld [vmem:[#allocation7 + $0x30] sm:$0xff]  ;;  %v194_v35 = vld [vmem:[#allocation10 + $0x28] sm:$0xff]  ;;  %v193_v38 = vld [vmem:[#allocation10 + $0x20] sm:$0xff] }
  0x20   :  { %163 = vmatpush.msra.mxu1 %v150_v10  ;;  %210 = vmatpush.msra.mxu2 %v199_v20  ;;  %v101_v36 = vld [vmem:[#allocation7 + $0x28] sm:$0xff]  ;;  %v92_v39 = vld [vmem:[#allocation4] sm:$0xff]  ;;  %v100_v40 = vld [vmem:[#allocation7 + $0x20] sm:$0xff] }
  0x21   :  { %117 = vmatpush.msra.mxu0 %v106_v21  ;;  %266 = vmatpush.msra.mxu3 %v106_v21  ;;  %v192_v41 = vld [vmem:[#allocation10 + $0x18] sm:$0xff]  ;;  %v191_v43 = vld [vmem:[#allocation10 + $0x10] sm:$0xff]  ;;  %v190_v45 = vld [vmem:[#allocation10 + $0x8] sm:$0xff] }
  0x22   :  { %164 = vmatpush.msra.mxu1 %v149_v13  ;;  %211 = vmatpush.msra.mxu2 %v198_v23  ;;  %v99_v42 = vld [vmem:[#allocation7 + $0x18] sm:$0xff]  ;;  %v98_v44 = vld [vmem:[#allocation7 + $0x10] sm:$0xff]  ;;  %v189_v47 = vld [vmem:[#allocation10] sm:$0xff] }
  0x23   :  { %118 = vmatpush.msra.mxu0 %v105_v24  ;;  %267 = vmatpush.msra.mxu3 %v105_v24  ;;  %v93_v46 = vld [vmem:[#allocation4 + $0x8] sm:$0xff]  ;;  %v97_v48 = vld [vmem:[#allocation7 + $0x8] sm:$0xff]  ;;  %v96_v49 = vld [vmem:[#allocation7] sm:$0xff] }
  0x24   :  { %165 = vmatpush.msra.mxu1 %v148_v16  ;;  %212 = vmatpush.msra.mxu2 %v197_v26  ;;  %v284_v52 = vld [vmem:[%s485_s2] ss:$0 sm:$0xff] }
  0x25   :  { %119 = vmatpush.msra.mxu0 %v104_v27  ;;  %268 = vmatpush.msra.mxu3 %v104_v27 }
  0x26   :  { %166 = vmatpush.msra.mxu1 %v147_v19  ;;  %213 = vmatpush.msra.mxu2 %v196_v29 }
  0x27   :  { %120 = vmatpush.msra.mxu0 %v103_v30  ;;  %269 = vmatpush.msra.mxu3 %v103_v30 }
  0x28   :  { %167 = vmatpush.msra.mxu1 %v146_v22  ;;  %214 = vmatpush.msra.mxu2 %v195_v32 }
  0x29   :  { %121 = vmatpush.msra.mxu0 %v102_v33  ;;  %270 = vmatpush.msra.mxu3 %v102_v33 }
  0x2a   :  { %168 = vmatpush.msra.mxu1 %v145_v25  ;;  %215 = vmatpush.msra.mxu2 %v194_v35 }
  0x2b   :  { %122 = vmatpush.msra.mxu0 %v101_v36  ;;  %271 = vmatpush.msra.mxu3 %v101_v36 }
  0x2c   :  { %169 = vmatpush.msra.mxu1 %v144_v28  ;;  %216 = vmatpush.msra.mxu2 %v193_v38 }
  0x2d   :  { %123 = vmatpush.msra.mxu0 %v100_v40  ;;  %272 = vmatpush.msra.mxu3 %v100_v40 }
  0x2e   :  { %170 = vmatpush.msra.mxu1 %v143_v31  ;;  %217 = vmatpush.msra.mxu2 %v192_v41 }
  0x2f   :  { %124 = vmatpush.msra.mxu0 %v99_v42  ;;  %273 = vmatpush.msra.mxu3 %v99_v42 }
  0x30   :  { %171 = vmatpush.msra.mxu1 %v142_v34  ;;  %218 = vmatpush.msra.mxu2 %v191_v43 }
  0x31   :  { %125 = vmatpush.msra.mxu0 %v98_v44  ;;  %274 = vmatpush.msra.mxu3 %v98_v44 }
  0x32   :  { %172 = vmatpush.msra.mxu1 %v141_v37  ;;  %219 = vmatpush.msra.mxu2 %v190_v45 }
  0x33   :  { %173 = vmatmul.f32.vlgmr.msra.gmra.mxu1 %v92_v39  ;;  %126 = vmatpush.msra.mxu0 %v97_v48 }
  0x34   :  { %220 = vmatpush.msra.mxu2 %v189_v47  ;;  %275 = vmatpush.msra.mxu3 %v97_v48 }
  0x35   :  { %127 = vmatpush.msra.mxu0 %v96_v49 }
  0x36   :  { %276 = vmatpush.msra.mxu3 %v96_v49  ;;  %128 = vmatmul.f32.vlgmr.msra.gmra.mxu0 %v92_v39 }
  0x37   :  { %131 = vmatmul.f32.vlgmr.msra.gmra.mxu3 %v93_v46 }
  0x3b   :  { %176 = vmatmul.f32.gmra.mxu1 %v93_v46 }
  0xb0   :  { %v174_v50 = vpop.f32.mrf.mxu1 }
  0xb1   :  { %221 = vmatmul.f32.vlgmr.msra.gmra.mxu2 %v174_v50 }
  0xb3   :  { %v129_v53 = vpop.f32.mrf.mxu0 }
  0xb4   :  { %v234_v54 = vadd.f32 %v284_v52, %v129_v53 }
  0xb8   :  { %v177_v51 = vpop.f32.mrf.mxu1 }
  0xb9   :  { %224 = vmatmul.f32.gmra.mxu2 %v177_v51 }
  0xba   :  { %v132_v57 = vpop.f32.mrf.mxu3 }
  0xbb   :  { %v235_v58 = vadd.f32 %v284_v52, %v132_v57 }
 0x134   :  { %v222_v55 = vpop.f32.mrf.mxu2 }
 0x135   :  { %v236_v56 = vadd.f32 %v234_v54, %v222_v55 }
 0x137   :  { %238 = vst [vmem:[#allocation12] sm:$0xff] %v236_v56 }
 0x13c   :  { %v225_v59 = vpop.f32.mrf.mxu2 }
 0x13d   :  { %v237_v60 = vadd.f32 %v235_v58, %v225_v59 }
 0x13f   :  { %239 = vst [vmem:[#allocation12 + $0x8] sm:$0xff] %v237_v60 }
 0x140   :  { %252 = dma.vmem_to_hbm [thread:$0]  %s245_s14, 256, %s247_s17, [#allocation6], %s414_s26, %s414_s26, %s415_s27  }
 0x141   :  { %411 = dma.done.wait [#allocation6], 256  }
 0x142   :  { %412 = vsyncadd [#allocation6], 4294967040 }
 0x143   :  { %257 = vsyncpa [#allocation5], 1 }
 0x144   :  { %258 = vsyncpa [#allocation8], 1 }
 0x145   :  { %259 = vsyncpa [#allocation11], 1 }
 0x146   :  { %260 = vsyncpa [#allocation6], 1 }

</bundles_post_ra>
